<compile_context>
chip_gen: v7x
topology: tpu7x:2x2x1
jax: 0.10.0
libtpu: 0.0.40
codegen_flags: <defaults>
</compile_context>

<pallas_src>
import functools

import jax
import jax.numpy as jnp
from jax.experimental import pallas as pl
from jax.experimental.pallas import tpu as pltpu

HIDDEN = 24


# ---------------------------------------------------------------------------
# Fast path: single-block fully fused kernel (whole batch resident in VMEM).
#   x (B, input_dim) -> out (B, A), including global adv.mean().
# ---------------------------------------------------------------------------
def _fused_single_block_kernel(x_ref, w1_ref, b1_ref, w2_ref, b2_ref,
                               wva_ref, bva_ref, out_ref):
    x = x_ref[...].astype(jnp.float32)

    h1 = jnp.dot(x, w1_ref[...], preferred_element_type=jnp.float32) + b1_ref[...]
    h1 = jnp.maximum(h1, 0.0)

    h2 = jnp.dot(h1, w2_ref[...], preferred_element_type=jnp.float32) + b2_ref[...]
    h2 = jnp.maximum(h2, 0.0)

    # Fused head matmul: column 0 is the value stream, 1: is advantage.
    va = jnp.dot(h2, wva_ref[...], preferred_element_type=jnp.float32) + bva_ref[...]
    value = va[:, 0:1]
    adv = va[:, 1:]

    # torch: advantages.mean() is a GLOBAL scalar mean over all elements.
    mean = jnp.mean(adv)
    out_ref[...] = (value + (adv - mean)).astype(out_ref.dtype)


# ---------------------------------------------------------------------------
# Fallback pass 1 (large batches): fused MLP + (value | advantage) head.
#   x tile (TB, input_dim)  ->  va tile (TB, 1+A)   [col 0 = value, 1: = adv]
# Weights / biases are whole-array, VMEM-resident blocks.
# ---------------------------------------------------------------------------
def _mlp_head_kernel(x_ref, w1_ref, b1_ref, w2_ref, b2_ref,
                     wva_ref, bva_ref, va_ref):
    x = x_ref[...].astype(jnp.float32)

    h1 = jnp.dot(x, w1_ref[...], preferred_element_type=jnp.float32) + b1_ref[...]
    h1 = jnp.maximum(h1, 0.0)

    h2 = jnp.dot(h1, w2_ref[...], preferred_element_type=jnp.float32) + b2_ref[...]
    h2 = jnp.maximum(h2, 0.0)

    va = jnp.dot(h2, wva_ref[...], preferred_element_type=jnp.float32) + bva_ref[...]
    va_ref[...] = va.astype(va_ref.dtype)


# ---------------------------------------------------------------------------
# Fallback pass 2: dueling combine   out = value + (adv - global_mean)
#   va tile (TB, 1+A), scalar mean in SMEM  ->  out tile (TB, A)
# ---------------------------------------------------------------------------
def _dueling_combine_kernel(va_ref, mean_ref, out_ref):
    va = va_ref[...]
    value = va[:, 0:1]
    adv = va[:, 1:]
    mean = mean_ref[0, 0]
    out_ref[...] = (value + (adv - mean)).astype(out_ref.dtype)


def _pick_batch_tile(B, row_width_f32, tile_batch):
    """Batch tile: multiple of 8 sublanes, clamped by a conservative VMEM
    budget so the double-buffered pipeline fits v5e/v6e/v7x defaults."""
    bytes_per_row = 4 * row_width_f32
    vmem_budget = 8 * 1024 * 1024            # per stream, 2x-buffered -> /2
    max_tb = max(8, (vmem_budget // (2 * bytes_per_row)) // 8 * 8)
    tb = min(tile_batch, max_tb)
    if tb >= B:
        return B                              # one full-batch block
    return max(8, (tb // 8) * 8)


def fuse_head_params(params):
    """Concatenate value/advantage heads once on the host -> one matmul."""
    return dict(
        w1=params["w1"], b1=params["b1"],
        w2=params["w2"], b2=params["b2"],
        wva=jnp.concatenate([params["wv"], params["wa"]], axis=1),   # (H, 1+A)
        bva=jnp.concatenate([params["bv"], params["ba"]], axis=1),   # (1, 1+A)
    )


def dueling_dqn_forward(x, fused_params, *, tile_batch=512,
                        single_block_budget_bytes=8 * 1024 * 1024):
    """x: (B, input_dim) float32.  fused_params: output of fuse_head_params."""
    B, input_dim = x.shape
    va_cols = fused_params["wva"].shape[1]        # 1 + A
    A = va_cols - 1

    param_args = (fused_params["w1"], fused_params["b1"],
                  fused_params["w2"], fused_params["b2"],
                  fused_params["wva"], fused_params["bva"])

    # ---- fast path: everything fits VMEM -> single fully fused kernel -----
    act_bytes = 4 * B * (input_dim + 2 * HIDDEN + va_cols + A)
    if act_bytes <= single_block_budget_bytes:
        vmem = pl.BlockSpec(memory_space=pltpu.MemorySpace.VMEM)
        return pl.pallas_call(
            _fused_single_block_kernel,
            out_shape=jax.ShapeDtypeStruct((B, A), jnp.float32),
            in_specs=[vmem] * 7,
            out_specs=vmem,
        )(x, *param_args)

    # ---- fallback: batch-tiled two-pass pipeline ---------------------------
    TB = _pick_batch_tile(B, input_dim + 2 * va_cols, tile_batch)
    nt = pl.cdiv(B, TB)

    resident = lambda arr: pl.BlockSpec(arr.shape, lambda i: (0, 0))

    # pass 1: MLP + fused (value|advantage) head
    va = pl.pallas_call(
        _mlp_head_kernel,
        out_shape=jax.ShapeDtypeStruct((B, va_cols), jnp.float32),
        grid=(nt,),
        in_specs=[
            pl.BlockSpec((TB, input_dim), lambda i: (i, 0)),
            resident(fused_params["w1"]), resident(fused_params["b1"]),
            resident(fused_params["w2"]), resident(fused_params["b2"]),
            resident(fused_params["wva"]), resident(fused_params["bva"]),
        ],
        out_specs=pl.BlockSpec((TB, va_cols), lambda i: (i, 0)),
        compiler_params=pltpu.CompilerParams(
            dimension_semantics=("parallel",)),
    )(x, *param_args)

    # global scalar mean over ALL advantage elements (torch .mean()).
    # Cross-tile coupling handled as a tiny scalar reduce between the two
    # Pallas passes so both grids stay batch-parallel (v7x megacore friendly).
    adv_mean = jnp.mean(va[:, 1:]).reshape(1, 1).astype(jnp.float32)

    # pass 2: dueling combine
    out = pl.pallas_call(
        _dueling_combine_kernel,
        out_shape=jax.ShapeDtypeStruct((B, A), jnp.float32),
        grid=(nt,),
        in_specs=[
            pl.BlockSpec((TB, va_cols), lambda i: (i, 0)),
            pl.BlockSpec(memory_space=pltpu.MemorySpace.SMEM),   # scalar mean
        ],
        out_specs=pl.BlockSpec((TB, A), lambda i: (i, 0)),
        compiler_params=pltpu.CompilerParams(
            dimension_semantics=("parallel",)),
    )(va, adv_mean)

    return out


def init_params(key, input_dim, output_dim):
    """Deterministic init mimicking PyTorch nn.Linear default
    (uniform in [-1/sqrt(fan_in), 1/sqrt(fan_in)]); weights stored (in, out)."""
    ks = jax.random.split(key, 8)

    def linear(kw, kb, fan_in, fan_out):
        bound = 1.0 / jnp.sqrt(jnp.float32(fan_in))
        w = jax.random.uniform(kw, (fan_in, fan_out), jnp.float32, -bound, bound)
        b = jax.random.uniform(kb, (1, fan_out), jnp.float32, -bound, bound)
        return w, b

    w1, b1 = linear(ks[0], ks[1], input_dim, HIDDEN)
    w2, b2 = linear(ks[2], ks[3], HIDDEN, HIDDEN)
    wv, bv = linear(ks[4], ks[5], HIDDEN, 1)
    wa, ba = linear(ks[6], ks[7], HIDDEN, output_dim)
    return dict(w1=w1, b1=b1, w2=w2, b2=b2, wv=wv, bv=bv, wa=wa, ba=ba)


def reference_forward(x, p):
    """Pure-JAX reference for correctness check."""
    h1 = jnp.maximum(x @ p["w1"] + p["b1"], 0.0)
    h2 = jnp.maximum(h1 @ p["w2"] + p["b2"], 0.0)
    value = h2 @ p["wv"] + p["bv"]
    adv = h2 @ p["wa"] + p["ba"]
    return value + (adv - jnp.mean(adv))


if __name__ == "__main__":
    key = jax.random.PRNGKey(0)
    k_x, k_p, k_x2 = jax.random.split(key, 3)

    input_dim, output_dim = 16, 4
    params = init_params(k_p, input_dim, output_dim)
    fused = fuse_head_params(params)

    # Small-batch case (fast path: single fully fused VMEM-resident kernel).
    fwd = jax.jit(dueling_dqn_forward)
    x = jax.random.normal(k_x, (2, input_dim), jnp.float32)
    out = jax.block_until_ready(fwd(x, fused))
    ref = reference_forward(x, params)
    assert out.shape == (2, output_dim)
    assert jnp.allclose(out, ref, atol=1e-5, rtol=1e-5), (out, ref)

    # Tiled fallback path (forced via a zero single-block budget): 96 rows,
    # 32-row tiles, batch-parallel two-pass pipeline.
    fwd_tiled = jax.jit(functools.partial(
        dueling_dqn_forward, tile_batch=32, single_block_budget_bytes=0))
    x_big = jax.random.normal(k_x2, (96, input_dim), jnp.float32)
    out_big = jax.block_until_ready(fwd_tiled(x_big, fused))
    ref_big = reference_forward(x_big, params)
    assert out_big.shape == (96, output_dim)
    assert jnp.allclose(out_big, ref_big, atol=1e-5, rtol=1e-5)

    print("KERNEL_OK")
</pallas_src>

<mosaic_0001>
module attributes {stable_mosaic.version = 11 : i64} {
  func.func @_fused_single_block_kernel(%arg0: memref<2x16xf32, #tpu.memory_space<vmem>>, %arg1: memref<16x24xf32, #tpu.memory_space<vmem>>, %arg2: memref<1x24xf32, #tpu.memory_space<vmem>>, %arg3: memref<24x24xf32, #tpu.memory_space<vmem>>, %arg4: memref<1x24xf32, #tpu.memory_space<vmem>>, %arg5: memref<24x5xf32, #tpu.memory_space<vmem>>, %arg6: memref<1x5xf32, #tpu.memory_space<vmem>>, %arg7: memref<2x4xf32, #tpu.memory_space<vmem>>) attributes {dimension_semantics = [], scalar_prefetch = 0 : i64, scratch_operands = 0 : i64, tpu.core_type = #tpu.core_type<tc>} {
    %c0 = arith.constant 0 : index
    %c0_0 = arith.constant 0 : index
    %0 = vector.load %arg0[%c0, %c0_0] : memref<2x16xf32, #tpu.memory_space<vmem>>, vector<2x16xf32>
    %c0_1 = arith.constant 0 : index
    %c0_2 = arith.constant 0 : index
    %1 = vector.load %arg1[%c0_1, %c0_2] : memref<16x24xf32, #tpu.memory_space<vmem>>, vector<16x24xf32>
    %cst = arith.constant dense<0.000000e+00> : vector<2x24xf32>
    %2 = tpu.matmul %0, %1, %cst {dimension_numbers = #tpu.dot_dimension_numbers<[1], [0], [0], [1], [0, 0, 1, 1], [], []>} : vector<2x16xf32>, vector<16x24xf32>, vector<2x24xf32> -> vector<2x24xf32>
    %c0_3 = arith.constant 0 : index
    %c0_4 = arith.constant 0 : index
    %3 = vector.load %arg2[%c0_3, %c0_4] : memref<1x24xf32, #tpu.memory_space<vmem>>, vector<1x24xf32>
    %4 = vector.broadcast %3 : vector<1x24xf32> to vector<2x24xf32>
    %5 = arith.addf %2, %4 : vector<2x24xf32>
    %cst_5 = arith.constant 0.000000e+00 : f32
    %6 = vector.broadcast %cst_5 : f32 to vector<2x24xf32>
    %7 = arith.maximumf %5, %6 : vector<2x24xf32>
    %c0_6 = arith.constant 0 : index
    %c0_7 = arith.constant 0 : index
    %8 = vector.load %arg3[%c0_6, %c0_7] : memref<24x24xf32, #tpu.memory_space<vmem>>, vector<24x24xf32>
    %cst_8 = arith.constant dense<0.000000e+00> : vector<2x24xf32>
    %9 = tpu.matmul %7, %8, %cst_8 {dimension_numbers = #tpu.dot_dimension_numbers<[1], [0], [0], [1], [0, 0, 1, 1], [], []>} : vector<2x24xf32>, vector<24x24xf32>, vector<2x24xf32> -> vector<2x24xf32>
    %c0_9 = arith.constant 0 : index
    %c0_10 = arith.constant 0 : index
    %10 = vector.load %arg4[%c0_9, %c0_10] : memref<1x24xf32, #tpu.memory_space<vmem>>, vector<1x24xf32>
    %11 = vector.broadcast %10 : vector<1x24xf32> to vector<2x24xf32>
    %12 = arith.addf %9, %11 : vector<2x24xf32>
    %cst_11 = arith.constant 0.000000e+00 : f32
    %13 = vector.broadcast %cst_11 : f32 to vector<2x24xf32>
    %14 = arith.maximumf %12, %13 : vector<2x24xf32>
    %c0_12 = arith.constant 0 : index
    %c0_13 = arith.constant 0 : index
    %15 = vector.load %arg5[%c0_12, %c0_13] : memref<24x5xf32, #tpu.memory_space<vmem>>, vector<24x5xf32>
    %cst_14 = arith.constant dense<0.000000e+00> : vector<2x5xf32>
    %16 = tpu.matmul %14, %15, %cst_14 {dimension_numbers = #tpu.dot_dimension_numbers<[1], [0], [0], [1], [0, 0, 1, 1], [], []>} : vector<2x24xf32>, vector<24x5xf32>, vector<2x5xf32> -> vector<2x5xf32>
    %c0_15 = arith.constant 0 : index
    %c0_16 = arith.constant 0 : index
    %17 = vector.load %arg6[%c0_15, %c0_16] : memref<1x5xf32, #tpu.memory_space<vmem>>, vector<1x5xf32>
    %18 = vector.broadcast %17 : vector<1x5xf32> to vector<2x5xf32>
    %19 = arith.addf %16, %18 : vector<2x5xf32>
    %20 = vector.extract_strided_slice %19 {offsets = [0, 0], sizes = [2, 1], strides = [1, 1]} : vector<2x5xf32> to vector<2x1xf32>
    %21 = vector.extract_strided_slice %19 {offsets = [0, 1], sizes = [2, 4], strides = [1, 1]} : vector<2x5xf32> to vector<2x4xf32>
    %22 = vector.shape_cast %21 : vector<2x4xf32> to vector<1x2x4xf32>
    %cst_17 = arith.constant dense<0.000000e+00> : vector<1xf32>
    %23 = vector.multi_reduction <add>, %22, %cst_17 [1, 2] : vector<1x2x4xf32> to vector<1xf32>
    %24 = vector.shape_cast %23 : vector<1xf32> to vector<1x1x1xf32>
    %25 = vector.extract %24[0, 0, 0] : f32 from vector<1x1x1xf32>
    %cst_18 = arith.constant 8.000000e+00 : f32
    %26 = arith.divf %25, %cst_18 : f32
    %27 = vector.broadcast %26 : f32 to vector<2x4xf32>
    %28 = arith.subf %21, %27 : vector<2x4xf32>
    %29 = vector.broadcast %20 : vector<2x1xf32> to vector<2x4xf32>
    %30 = arith.addf %29, %28 : vector<2x4xf32>
    %c0_19 = arith.constant 0 : index
    %c0_20 = arith.constant 0 : index
    %31 = vector.load %arg7[%c0_19, %c0_20] : memref<2x4xf32, #tpu.memory_space<vmem>>, vector<2x4xf32>
    tpu.vector_store %arg7[%c0_19, %c0_20], %30 {strides = array<i32>} : memref<2x4xf32, #tpu.memory_space<vmem>>, vector<2x4xf32>,
    return
  }
}

</mosaic_0001>

<bundles_post_ra>
// kernel: dueling_dqn_forward.1
= control target key start
LH: loop header
LB: loop body
LE: loop exit
PB: predicated region body
PF: predicated region fallthrough
CT: control target
= control target key end

     0   :  { %12 = vsyncpa [#allocation3], 0  ;;  %s645_s0 = inlined_call_operand.vmem [shape: f32[2,16], index: 0, kind: input, shape index: {}]   ;;  %s646_s1 = inlined_call_operand.vmem [shape: f32[16,24], index: 1, kind: input, shape index: {}]   ;;  %s647_s2 = inlined_call_operand.hbm [shape: f32[1,24], index: 2, kind: input, shape index: {}]   ;;  %s648_s3 = inlined_call_operand.vmem [shape: f32[24,24], index: 3, kind: input, shape index: {}]   ;;  %s649_s4 = inlined_call_operand.hbm [shape: f32[1,24], index: 4, kind: input, shape index: {}]   ;;  %s650_s5 = inlined_call_operand.vmem [shape: f32[24,5], index: 5, kind: input, shape index: {}]   ;;  %s651_s6 = inlined_call_operand.hbm [shape: f32[1,5], index: 6, kind: input, shape index: {}]   ;;  %s652_s7 = inlined_call_operand.hbm [shape: f32[2,4], index: 7, kind: output, shape index: {}]  }
   0x1   :  { %13 = vsyncpa [#allocation6], 0 }
   0x2   :  { %14 = vsyncpa [#allocation4], 0  ;;  %s519_s24 = smov [#allocation5]   ;;  %s520_s26 = smov [#allocation2]  }
   0x3   :  { %s37_s25 = sshll.u32 %s519_s24, 4  ;;  %s25_s27 = sshll.u32 %s520_s26, 4  ;;  %s38_s25 = int_to_ptr.vmem [resolvable:$true] %s37_s25  ;;  %s26_s27 = int_to_ptr.vmem [resolvable:$true] %s25_s27 }
   0x4   :  { %s425_s30 = scalar_lea.hbm %s649_s4, 16 }
   0x5   :  { %p426_p0 = scmp.ne.s32.totalorder %s649_s4, %s425_s30  ;;  %p429_p1 = scmp.lt.u32.totalorder %s425_s30, %s649_s4 }
   0x7   :  { %p431_p2 = pnand %p429_p1, %p426_p0 }
   0x9   :  { %434 = shalt.err (!%p431_p2)
}
   0xa   :  { %s435_s12 = scalar_lea.vmem %s38_s25, 16  ;;  %s439_s13 = scalar_lea.vmem %s38_s25, 32 }
   0xb   :  { %p436_p3 = scmp.ne.s32.totalorder %s38_s25, %s435_s12  ;;  %p440_p4 = scmp.lt.s32.totalorder %s38_s25, %s38_s25 }
   0xc   :  { %p441_p5 = scmp.lt.s32.totalorder %s439_s13, %s435_s12 }
   0xe   :  { %p442_p6 = por %p441_p5, %p440_p4 }
  0x10   :  { %p443_p7 = pnand %p442_p6, %p436_p3 }
  0x12   :  { %446 = shalt.err (!%p443_p7)
}
  0x13   :  { %40 = dma.hbm_to_vmem [thread:$0]  %s649_s4, 16, %s38_s25, [#allocation6]  }
  0x14   :  { %s447_s18 = scalar_lea.hbm %s647_s2, 16 }
  0x15   :  { %p448_p8 = scmp.ne.s32.totalorder %s647_s2, %s447_s18  ;;  %p451_p9 = scmp.lt.u32.totalorder %s447_s18, %s647_s2 }
  0x17   :  { %p453_p10 = pnand %p451_p9, %p448_p8 }
  0x19   :  { %456 = shalt.err (!%p453_p10)
}
  0x1a   :  { %s457_s23 = scalar_lea.vmem %s26_s27, 16  ;;  %s461_s24 = scalar_lea.vmem %s26_s27, 32 }
  0x1b   :  { %p458_p11 = scmp.ne.s32.totalorder %s26_s27, %s457_s23  ;;  %p462_p12 = scmp.lt.s32.totalorder %s26_s27, %s26_s27 }
  0x1c   :  { %p463_p13 = scmp.lt.s32.totalorder %s461_s24, %s457_s23 }
  0x1e   :  { %p464_p0 = por %p463_p13, %p462_p12 }
  0x20   :  { %p465_p1 = pnand %p464_p0, %p458_p11 }
  0x22   :  { %468 = shalt.err (!%p465_p1)
}
  0x23   :  { %28 = dma.hbm_to_vmem [thread:$0]  %s647_s2, 16, %s26_s27, [#allocation3]  }
  0x24   :  { %s521_s26 = smov [#allocation7]   ;;  %s469_s8 = scalar_lea.hbm %s651_s6, 16 }
  0x25   :  { %s49_s28 = sshll.u32 %s521_s26, 4  ;;  %p470_p2 = scmp.ne.s32.totalorder %s651_s6, %s469_s8  ;;  %s50_s28 = int_to_ptr.vmem [resolvable:$true] %s49_s28 }
  0x26   :  { %p473_p3 = scmp.lt.u32.totalorder %s469_s8, %s651_s6 }
  0x28   :  { %p475_p4 = pnand %p473_p3, %p470_p2 }
  0x2a   :  { %478 = shalt.err (!%p475_p4)
}
  0x2b   :  { %s479_s13 = scalar_lea.vmem %s50_s28, 16  ;;  %s483_s2 = scalar_lea.vmem %s50_s28, 32 }
  0x2c   :  { %p480_p5 = scmp.ne.s32.totalorder %s50_s28, %s479_s13  ;;  %p484_p6 = scmp.lt.s32.totalorder %s50_s28, %s50_s28 }
  0x2d   :  { %p485_p7 = scmp.lt.s32.totalorder %s483_s2, %s479_s13 }
  0x2f   :  { %p486_p8 = por %p485_p7, %p484_p6 }
  0x31   :  { %p487_p9 = pnand %p486_p8, %p480_p5 }
  0x33   :  { %490 = shalt.err (!%p487_p9)
}
  0x34   :  { %52 = dma.hbm_to_vmem [thread:$0]  %s651_s6, 16, %s50_s28, [#allocation6]  }
  0x35   :  { %513 = dma.done.wait [#allocation3], 16  }
  0x36   :  { %514 = vsyncadd [#allocation3], 4294967280 }
  0x37   :  { %515 = dma.done.wait [#allocation6], 32  }
  0x38   :  { %516 = vsyncadd [#allocation6], 4294967264  ;;  %v522_v0 = vmov 0.0|0.0   ;;  %vm523_vm0 = vmmov 0   ;;  %v524_v1 = vmov 0.0   ;;  %v63_v2 = vld [vmem:[%s646_s1] sm:$0xff] }
  0x39   :  { %403 = vmatprep.subr.bf16.mxu0 %v522_v0  ;;  %382 = vmatprep.mubr.msk.f32.mxu0 %vm523_vm0, %v524_v1  ;;  %v64_v3 = vld [vmem:[%s646_s1 + $0x8] sm:$0xff]  ;;  %v62_v5 = vld [vmem:[%s645_s0] sm:$0x3]  ;;  %vm72_vm1 = vcmask 130048   ;;  %v149_v9 = vld [vmem:[%s648_s3 + $0x10] sm:$0xff]  ;;  %vm157_vm2 = vcmask 195584  }
  0x3a   :  { %406 = vmatprep.subr.bf16.mxu1 %v522_v0  ;;  %391 = vmatprep.mubr.msk.f32.mxu1 %vm523_vm0, %v524_v1  ;;  %v404_v4 = vpack.c.bf16 %v64_v3, %v63_v2  ;;  %v147_v6 = vld [vmem:[%s648_s3] sm:$0xff]  ;;  %v148_v7 = vld [vmem:[%s648_s3 + $0x8] sm:$0xff]  ;;  %v234_v18 = vld [vmem:[%s650_s5 + $0x10] sm:$0xff]  ;;  %v525_v24 = vmov 0   ;;  %s526_s29 = smov 127   ;;  %vm319_vm3 = vcmask 25600  }
  0x3b   :  { %v407_v8 = vpack.c.bf16 %v148_v7, %v147_v6  ;;  %v232_v10 = vld [vmem:[%s650_s5] sm:$0xff]  ;;  %v233_v11 = vld [vmem:[%s650_s5 + $0x8] sm:$0xff]  ;;  %423 = vset.pattern.permute.xlu1 %v525_v24  ;;  %424 = vset.pattern.permute.xlu0 %v525_v24  ;;  %s527_s8 = smov [#allocation8]  }
  0x3c   :  { %405 = vmatpush3.bf16.msra.mxu0 %v404_v4  ;;  %v410_v12 = vpack.c.bf16 %v233_v11, %v232_v10  ;;  %v361_v13 = vld [vmem:[#allocation2] ss:$0 sm:$0xff]  ;;  %v363_v19 = vld [vmem:[#allocation5] ss:$0 sm:$0xff]  ;;  %v365_v25 = vld [vmem:[#allocation7] ss:$0 sm:$0xff] }
  0x3d   :  { %409 = vmatprep.subr.bf16.mxu0 %v522_v0  ;;  %408 = vmatpush3.bf16.msra.mxu1 %v407_v8  ;;  %s351_s9 = sshll.u32 %s527_s8, 4  ;;  %s352_s9 = int_to_ptr.vmem [resolvable:$true] %s351_s9 }
  0x3e   :  { %389 = vmatprep.subr.mxu1 %v524_v1  ;;  %s491_s10 = scalar_lea.vmem %s352_s9, 32  ;;  %p496_p11 = scmp.lt.s32.totalorder %s352_s9, %s352_s9 }
  0x3f   :  { %383 = vmatmul.mubr.msk.f32.vlgmr.msra.gmra.mrb[0].mxu0 %vm72_vm1, %v62_v5  ;;  %p492_p10 = scmp.ne.s32.totalorder %s352_s9, %s491_s10  ;;  %p497_p12 = scmp.lt.s32.totalorder %s491_s10, %s491_s10 }
  0x40   :  { %400 = vmatprep.mubr.msk.f32.mxu0 %vm523_vm0, %v524_v1  ;;  %411 = vmatpush3.bf16.msra.mxu0 %v410_v12 }
  0x41   :  { %390 = vmatpush3.msra.mxu1 %v149_v9  ;;  %398 = vmatprep.subr.mxu0 %v524_v1  ;;  %p498_p13 = por %p497_p12, %p496_p11 }
  0x43   :  { %p499_p0 = pnand %p498_p13, %p492_p10 }
  0x44   :  { %399 = vmatpush3.msra.mxu0 %v234_v18 }
 0x112   :  { %v142_v14 = vpop.f32.mrb[0].mxu0 }
 0x113   :  { %v143_v15 = vadd.f32 %v361_v13, %v142_v14  ;;  %v384_v16 = vpop.f32.mrb[1].mxu0 }
 0x115   :  { %v146_v17 = vmax.f32 %v143_v15, 0.0 }
 0x117   :  { %392 = vmatmul.mubr.msk.f32.vlgmr.msra.gmra.mrb[0].mxu1 %vm157_vm2, %v146_v17 }
 0x1ea   :  { %v227_v20 = vpop.f32.mrb[0].mxu1 }
 0x1eb   :  { %v228_v21 = vadd.f32 %v363_v19, %v227_v20  ;;  %v393_v22 = vpop.f32.mrb[1].mxu1 }
 0x1ed   :  { %v231_v23 = vmax.f32 %v228_v21, 0.0 }
 0x1ef   :  { %401 = vmatmul.mubr.msk.f32.vlgmr.msra.gmra.mrb[2].mxu0 %vm157_vm2, %v231_v23 }
 0x2c2   :  { %v311_v26 = vpop.f32.mrb[2].mxu0 }
 0x2c3   :  { %v312_v27 = vadd.f32 %v365_v25, %v311_v26  ;;  %v402_v28 = vpop.f32.mrb[3].mxu0 }
 0x2c5   :  { %336 = vperm.xlu1 %423, %v312_v27   ;;  %316 = vrot.lane.b32.xlu0 %v312_v27, %s526_s29 }
 0x337   :  { %v317_v29 = vpop.permute.xlu0 %316 }
 0x338   :  { %v320_v30 = vsel %vm319_vm3, %v317_v29, 0.0 }
 0x339   :  { %321 = vadd.xlane.f32.xlu0 %v320_v30 }
 0x344   :  { %v337_v40 = vpop.permute.xlu1 %336 }
 0x3c6   :  { %v322_v31 = vpop.xlane.xlu0 %321 }
 0x3c7   :  { %v323_v32 = vrot.slane %v322_v31, 4 }
 0x3c9   :  { %v324_v33 = vadd.f32 %v323_v32, %v322_v31 }
 0x3cb   :  { %v325_v34 = vrot.slane %v324_v33, 2 }
 0x3cd   :  { %v326_v35 = vadd.f32 %v325_v34, %v324_v33 }
 0x3cf   :  { %v327_v36 = vrot.slane %v326_v35, 1 }
 0x3d1   :  { %v328_v37 = vadd.f32 %v327_v36, %v326_v35 }
 0x3d3   :  { %412 = vpush %v328_v37 }
 0x404   :  { %s413_s5 = spop %412 }
 0x405   :  { %s332_s30 = smul.f32 0.125, %s413_s5 }
 0x407   :  { %v333_v38 = vstv %s332_s30 }
 0x408   :  { %v334_v39 = vsub.f32 %v312_v27, %v333_v38 }
 0x40a   :  { %v339_v41 = vadd.f32 %v337_v40, %v334_v39 }
 0x40c   :  { %341 = vrot.lane.b32.xlu1 %v339_v41, %s526_s29 }
 0x47e   :  { %v342_v42 = vpop.permute.xlu1 %341 }
 0x47f   :  { %344 = vst.msk [vmem:[#allocation8] sm:$0x3] %vm319_vm3, %v342_v42 }
 0x480   :  { %502 = shalt.err (!%p499_p0)
}
 0x481   :  { %s503_s13 = scalar_lea.hbm %s652_s7, 32 }
 0x482   :  { %p504_p1 = scmp.ne.s32.totalorder %s652_s7, %s503_s13  ;;  %p507_p2 = scmp.lt.u32.totalorder %s503_s13, %s652_s7 }
 0x484   :  { %p509_p3 = pnand %p507_p2, %p504_p1 }
 0x486   :  { %512 = shalt.err (!%p509_p3)
}
 0x487   :  { %354 = dma.vmem_to_hbm [thread:$0]  %s352_s9, 32, %s652_s7, [#allocation4]  }
 0x488   :  { %517 = dma.done.wait [#allocation4], 32  }
 0x489   :  { %518 = vsyncadd [#allocation4], 4294967264 }
 0x48a   :  { %358 = vsyncpa [#allocation3], 1 }
 0x48b   :  { %359 = vsyncpa [#allocation6], 1 }
 0x48c   :  { %360 = vsyncpa [#allocation4], 1 }

</bundles_post_ra>
